<compile_context>
chip_gen: v5e
topology: v5e:2x2
jax: 0.10.0
libtpu: 0.0.40
codegen_flags: <defaults>
</compile_context>

<pallas_src>
import functools

import jax
import jax.numpy as jnp
from jax import lax
from jax.experimental import pallas as pl
from jax.experimental.pallas import tpu as pltpu


def _round_up(v, m):
    return -(-v // m) * m


def _device_kind():
    try:
        return jax.devices()[0].device_kind.lower()
    except Exception:  # pragma: no cover - defensive
        return ""


def _supports_bf16_activations():
    """bf16 VPU/EUP exist on v6e / v7x; v5e (and unknown chips) stay f32."""
    kind = _device_kind()
    return ("v6" in kind) or ("v7" in kind) or ("7x" in kind)


def _pick_tiles(n):
    """Returns (BM lanes per grid step, in-kernel sub-chunk lanes)."""
    kind = _device_kind()
    multi_tc = any(t in kind for t in ("v7", "7x", "v5p", "v4"))
    n128 = _round_up(max(n, 1), 128)
    if multi_tc:
        # >=2 "parallel" grid steps whenever the batch allows it, so both
        # TensorCores receive work; cap each step at 512 lanes.
        bm = max(128, min(512, _round_up(pl.cdiv(n, 2), 128)))
        sub = bm
    else:
        # Single TensorCore: fewest, fattest grid steps (per-step overhead
        # dominates this tiny MLP); the in-kernel 512-lane sub-chunk loop
        # bounds vreg pressure at the TM=512 level.
        sub = min(512, n128)
        bm = min(2048, _round_up(n128, sub))
    return bm, sub


def _mlp_kernel(x_ref, wh_ref, vecs_ref, o_ref, *,
                input_dim, num_hidden, output_dim, sub, bf16_act):
    """One (., BM) batch block of the full MLP, batch-in-lanes layout.

    x_ref    : (D, BM)              f32   collocation points (batch in lanes)
    wh_ref   : (num_hidden-1, H, H) bf16  hidden->hidden weights, (out, in)
    vecs_ref : (H, D + L + O + 1)   f32   packed small parameters:
                 cols [0, D)          layer-0 weight columns
                 col  D + k (k < L)   bias of tanh-layer k
                 cols [D+L, D+L+O)    output-layer weight rows (as columns)
                 col  D + L + O       output biases (row o = bias o)
    o_ref    : (O, BM)              f32
    """
    D, L, O = input_dim, num_hidden, output_dim
    act_dt = jnp.bfloat16 if bf16_act else jnp.float32
    bm = x_ref.shape[1]
    num_sub = bm // sub

    # Hoist the tiny parameter slices: loaded once per grid step and reused by
    # every sub-chunk (JAX does not CSE broadcast_in_dim / repeated loads).
    w0_cols = [vecs_ref[:, d:d + 1] for d in range(D)]                  # (H,1)
    b0 = vecs_ref[:, D:D + 1]                                           # (H,1)
    b_hidden = [vecs_ref[:, D + 1 + k:D + 2 + k].astype(act_dt)
                for k in range(L - 1)]                                  # (H,1)
    w_hidden = [wh_ref[k] for k in range(L - 1)]                        # (H,H)
    w_out = [vecs_ref[:, D + L + o:D + L + o + 1] for o in range(O)]    # (H,1)
    b_out = [vecs_ref[o:o + 1, D + L + O:D + L + O + 1] for o in range(O)]

    def tile(lo):
        xs = x_ref[:, pl.ds(lo, sub)]                              # (D, sub)
        # ---- layer 0 (D -> H): VPU broadcast FMA in f32, no MXU.
        pre = b0 + w0_cols[0] * xs[0:1, :]
        for d in range(1, D):
            pre = pre + w0_cols[d] * xs[d:d + 1, :]
        h = jnp.tanh(pre.astype(act_dt))                           # (H, sub)
        # ---- hidden layers: bf16 MXU dots, f32 accumulate, bias+tanh act_dt.
        for k in range(L - 1):
            acc = jnp.dot(w_hidden[k], h.astype(jnp.bfloat16),
                          preferred_element_type=jnp.float32)      # (H,sub) f32
            h = jnp.tanh(acc.astype(act_dt) + b_hidden[k])
        # ---- output layer (H -> O): f32 VPU multiply + sublane reduction.
        for o in range(O):
            o_ref[o:o + 1, pl.ds(lo, sub)] = (
                jnp.sum(h * w_out[o], axis=0, keepdims=True) + b_out[o])

    if num_sub == 1:
        tile(0)
    else:
        # fori_loop (not a Python loop) so activation live ranges stay bounded
        # at the `sub`-lane level even when BM is 2048 lanes.
        def body(c, carry):
            tile(pl.multiple_of(c * sub, sub))
            return carry
        lax.fori_loop(0, num_sub, body, None)


def _pack_params(params, h_pad):
    """Pack PyTorch-layout params [(W(out,in), b(out,))] into (wh, vecs)."""
    L = len(params) - 1                  # number of tanh layers
    w0, b0 = params[0]
    wl, bl = params[-1]
    D = w0.shape[1]
    O = wl.shape[0]
    nodes = w0.shape[0]

    vecs = jnp.zeros((h_pad, D + L + O + 1), jnp.float32)
    vecs = vecs.at[:nodes, 0:D].set(w0.astype(jnp.float32))
    vecs = vecs.at[:nodes, D].set(b0.astype(jnp.float32))
    for k in range(1, L):
        vecs = vecs.at[:nodes, D + k].set(params[k][1].astype(jnp.float32))
    vecs = vecs.at[:nodes, D + L:D + L + O].set(wl.T.astype(jnp.float32))
    vecs = vecs.at[:O, D + L + O].set(bl.astype(jnp.float32))

    wh = jnp.zeros((max(L - 1, 1), h_pad, h_pad), jnp.bfloat16)
    for k in range(1, L):
        wh = wh.at[k - 1, :nodes, :nodes].set(params[k][0].astype(jnp.bfloat16))
    return wh, vecs


@functools.partial(jax.jit, static_argnames=("bf16_activations",))
def _forward_jit(x, params, *, bf16_activations):
    n, input_dim = x.shape
    nodes = params[0][0].shape[0]
    output_dim = params[-1][0].shape[0]
    num_hidden = len(params) - 1                 # tanh-layer count
    h_pad = max(8, _round_up(nodes, 8))          # 20 -> 24 sublanes

    wh, vecs = _pack_params(params, h_pad)

    # Batch-in-lanes view of the input, without any padded/zeroed copy.
    x = x.astype(jnp.float32)
    x_rows = x.reshape(1, n) if input_dim == 1 else x.T     # (D, N)

    bm, sub = _pick_tiles(n)

    kernel = functools.partial(_mlp_kernel, input_dim=input_dim,
                               num_hidden=num_hidden, output_dim=output_dim,
                               sub=sub, bf16_act=bool(bf16_activations))

    out = pl.pallas_call(
        kernel,
        out_shape=jax.ShapeDtypeStruct((output_dim, n), jnp.float32),
        grid_spec=pltpu.PrefetchScalarGridSpec(
            num_scalar_prefetch=0,
            grid=(pl.cdiv(n, bm),),                          # partial last block is masked
            in_specs=[
                pl.BlockSpec((input_dim, bm), lambda i: (0, i)),   # lane-dense
                pl.BlockSpec(wh.shape, lambda i: (0, 0, 0)),       # resident
                pl.BlockSpec(vecs.shape, lambda i: (0, 0)),        # resident
            ],
            out_specs=pl.BlockSpec((output_dim, bm), lambda i: (0, i)),
        ),
        compiler_params=pltpu.CompilerParams(
            dimension_semantics=("parallel",)),
    )(x_rows, wh, vecs)

    return out.T                                    # (N, Output_Dim)


def neural_network_forward(x, params, bf16_activations=None):
    """x: (N, Input_Dim) f32; params: list of (W, b) in PyTorch (out,in) layout."""
    if bf16_activations is None:
        bf16_activations = _supports_bf16_activations()
    return _forward_jit(x, params, bf16_activations=bool(bf16_activations))


def init_params(key, num_hidden_layers=3, nodes_per_layer=20,
                input_dim=1, output_dim=1):
    """PyTorch-layout params: W (out, in) xavier-uniform, b Linear-default."""
    dims = [input_dim] + [nodes_per_layer] * num_hidden_layers + [output_dim]
    params = []
    for i in range(len(dims) - 1):
        fan_in, fan_out = dims[i], dims[i + 1]
        key, kw, kb = jax.random.split(key, 3)
        bound_w = float(jnp.sqrt(6.0 / (fan_in + fan_out)))
        w = jax.random.uniform(kw, (fan_out, fan_in), jnp.float32,
                               -bound_w, bound_w)
        bound_b = 1.0 / float(jnp.sqrt(float(fan_in)))
        b = jax.random.uniform(kb, (fan_out,), jnp.float32, -bound_b, bound_b)
        params.append((w, b))
    return params


def reference_forward(x, params):
    """Pure f32 reference (HIGHEST-precision dots)."""
    h = x
    for w, b in params[:-1]:
        h = jnp.tanh(jnp.dot(h, w.T, precision=lax.Precision.HIGHEST) + b)
    w, b = params[-1]
    return jnp.dot(h, w.T, precision=lax.Precision.HIGHEST) + b


def reference_forward_matched(x, params, bf16_act):
    """Host emulation of the kernel's exact numerics (bf16 hidden matmuls,
    optional bf16 bias+tanh, f32 first/last layer)."""
    act_dt = jnp.bfloat16 if bf16_act else jnp.float32
    w0, b0 = params[0]
    pre = jnp.dot(x, w0.T, precision=lax.Precision.HIGHEST) + b0
    h = jnp.tanh(pre.astype(act_dt))
    for w, b in params[1:-1]:
        acc = jnp.dot(h.astype(jnp.bfloat16), w.T.astype(jnp.bfloat16),
                      preferred_element_type=jnp.float32)
        h = jnp.tanh(acc.astype(act_dt) + b.astype(act_dt))
    w, b = params[-1]
    return jnp.dot(h.astype(jnp.float32), w.T,
                   precision=lax.Precision.HIGHEST) + b


if __name__ == "__main__":
    key = jax.random.PRNGKey(0)
    k_param, k_x, k_x2 = jax.random.split(key, 3)

    INPUT_DIM, OUTPUT_DIM = 1, 1
    params = init_params(k_param, num_hidden_layers=3, nodes_per_layer=20,
                         input_dim=INPUT_DIM, output_dim=OUTPUT_DIM)

    bf16_act = _supports_bf16_activations()

    # Small batch of collocation points, shape (N, 1), like the PINN uses.
    x = jax.random.uniform(k_x, (64, INPUT_DIM), jnp.float32, -1.0, 1.0)
    try:
        out = jax.block_until_ready(
            neural_network_forward(x, params, bf16_activations=bf16_act))
    except Exception:
        # Defensive fallback: if this chip / jax build cannot lower bf16
        # bias+tanh inside Pallas, rerun with the always-correct f32 path.
        bf16_act = False
        out = jax.block_until_ready(
            neural_network_forward(x, params, bf16_activations=False))

    tol_match = 5e-2 if bf16_act else 2e-3   # vs numerics-matched reference
    tol_f32 = 2e-1 if bf16_act else 5e-2     # loose sanity bound vs pure f32

    ref_match = reference_forward_matched(x, params, bf16_act)
    ref_f32 = reference_forward(x, params)
    assert out.shape == (64, OUTPUT_DIM), out.shape
    err_match = float(jnp.max(jnp.abs(out - ref_match)))
    err_f32 = float(jnp.max(jnp.abs(out - ref_f32)))
    assert err_match < tol_match, \
        f"bf16_act={bf16_act}: mismatch vs matched reference: {err_match}"
    assert err_f32 < tol_f32, \
        f"bf16_act={bf16_act}: mismatch vs f32 reference: {err_f32}"

    # Larger, non-multiple-of-128 batch: exercises the masked partial last
    # block, the in-kernel sub-chunk loop (single-TC chips) and multi-step
    # "parallel" grids (dual-TC chips).
    x2 = jax.random.uniform(k_x2, (1500, INPUT_DIM), jnp.float32, -1.0, 1.0)
    out2 = jax.block_until_ready(
        neural_network_forward(x2, params, bf16_activations=bf16_act))
    ref2 = reference_forward_matched(x2, params, bf16_act)
    assert out2.shape == (1500, OUTPUT_DIM), out2.shape
    err2 = float(jnp.max(jnp.abs(out2 - ref2)))
    assert err2 < tol_match, \
        f"bf16_act={bf16_act}: mismatch vs matched reference (N=1500): {err2}"

    # NOTE: bf16 hidden matmuls / activations keep f32 accumulation; if PINN
    # higher-order derivatives need tighter accuracy, call with
    # bf16_activations=False (and drop the bf16 weight cast in _pack_params).
    print("KERNEL_OK")
</pallas_src>

<mosaic_0001>
module attributes {stable_mosaic.version = 11 : i64} {
  func.func @_mlp_kernel(%arg0: i32, %arg1: memref<1x128xf32, #tpu.memory_space<vmem>>, %arg2: memref<2x24x24xbf16, #tpu.memory_space<vmem>>, %arg3: memref<24x6xf32, #tpu.memory_space<vmem>>, %arg4: memref<1x128xf32, #tpu.memory_space<vmem>>) attributes {dimension_semantics = [#tpu.dimension_semantics<parallel>], iteration_bounds = array<i64: 1>, scalar_prefetch = 0 : i64, scratch_operands = 0 : i64, tpu.core_type = #tpu.core_type<tc>, window_params = [{transform_indices = @transform_0, window_bounds = array<i64: 1, 128>}, {pipeline_mode = #tpu.pipeline_mode<synchronous>, transform_indices = @transform_1, window_bounds = array<i64: 2, 24, 24>}, {pipeline_mode = #tpu.pipeline_mode<synchronous>, transform_indices = @transform_2, window_bounds = array<i64: 24, 6>}, {transform_indices = @transform_3, window_bounds = array<i64: 1, 128>}]} {
    %c0 = arith.constant 0 : index
    %c0_0 = arith.constant 0 : index
    %0 = vector.load %arg3[%c0, %c0_0] : memref<24x6xf32, #tpu.memory_space<vmem>>, vector<24x1xf32>
    %c0_1 = arith.constant 0 : index
    %c1 = arith.constant 1 : index
    %1 = vector.load %arg3[%c0_1, %c1] : memref<24x6xf32, #tpu.memory_space<vmem>>, vector<24x1xf32>
    %c0_2 = arith.constant 0 : index
    %c2 = arith.constant 2 : index
    %2 = vector.load %arg3[%c0_2, %c2] : memref<24x6xf32, #tpu.memory_space<vmem>>, vector<24x1xf32>
    %c0_3 = arith.constant 0 : index
    %c3 = arith.constant 3 : index
    %3 = vector.load %arg3[%c0_3, %c3] : memref<24x6xf32, #tpu.memory_space<vmem>>, vector<24x1xf32>
    %c0_4 = arith.constant 0 : index
    %c0_5 = arith.constant 0 : index
    %c0_6 = arith.constant 0 : index
    %4 = vector.load %arg2[%c0_4, %c0_5, %c0_6] : memref<2x24x24xbf16, #tpu.memory_space<vmem>>, vector<1x24x24xbf16>
    %5 = vector.shape_cast %4 : vector<1x24x24xbf16> to vector<24x24xbf16>
    %c1_7 = arith.constant 1 : index
    %c0_8 = arith.constant 0 : index
    %c0_9 = arith.constant 0 : index
    %6 = vector.load %arg2[%c1_7, %c0_8, %c0_9] : memref<2x24x24xbf16, #tpu.memory_space<vmem>>, vector<1x24x24xbf16>
    %7 = vector.shape_cast %6 : vector<1x24x24xbf16> to vector<24x24xbf16>
    %c0_10 = arith.constant 0 : index
    %c4 = arith.constant 4 : index
    %8 = vector.load %arg3[%c0_10, %c4] : memref<24x6xf32, #tpu.memory_space<vmem>>, vector<24x1xf32>
    %c0_11 = arith.constant 0 : index
    %c5 = arith.constant 5 : index
    %9 = vector.load %arg3[%c0_11, %c5] : memref<24x6xf32, #tpu.memory_space<vmem>>, vector<1x1xf32>
    %c0_12 = arith.constant 0 : index
    %c0_13 = arith.constant 0 : index
    %10 = vector.load %arg1[%c0_12, %c0_13] : memref<1x128xf32, #tpu.memory_space<vmem>>, vector<1x128xf32>
    %11 = vector.broadcast %0 : vector<24x1xf32> to vector<24x128xf32>
    %12 = vector.broadcast %10 : vector<1x128xf32> to vector<24x128xf32>
    %13 = arith.mulf %11, %12 : vector<24x128xf32>
    %14 = vector.broadcast %1 : vector<24x1xf32> to vector<24x128xf32>
    %15 = arith.addf %14, %13 : vector<24x128xf32>
    %16 = math.tanh %15 : vector<24x128xf32>
    %17 = arith.truncf %16 : vector<24x128xf32> to vector<24x128xbf16>
    %cst = arith.constant dense<0.000000e+00> : vector<24x128xf32>
    %18 = tpu.matmul %5, %17, %cst {dimension_numbers = #tpu.dot_dimension_numbers<[1], [0], [0], [1], [0, 0, 1, 1], [], []>} : vector<24x24xbf16>, vector<24x128xbf16>, vector<24x128xf32> -> vector<24x128xf32>
    %19 = vector.broadcast %2 : vector<24x1xf32> to vector<24x128xf32>
    %20 = arith.addf %18, %19 : vector<24x128xf32>
    %21 = math.tanh %20 : vector<24x128xf32>
    %22 = arith.truncf %21 : vector<24x128xf32> to vector<24x128xbf16>
    %cst_14 = arith.constant dense<0.000000e+00> : vector<24x128xf32>
    %23 = tpu.matmul %7, %22, %cst_14 {dimension_numbers = #tpu.dot_dimension_numbers<[1], [0], [0], [1], [0, 0, 1, 1], [], []>} : vector<24x24xbf16>, vector<24x128xbf16>, vector<24x128xf32> -> vector<24x128xf32>
    %24 = vector.broadcast %3 : vector<24x1xf32> to vector<24x128xf32>
    %25 = arith.addf %23, %24 : vector<24x128xf32>
    %26 = math.tanh %25 : vector<24x128xf32>
    %27 = vector.broadcast %8 : vector<24x1xf32> to vector<24x128xf32>
    %28 = arith.mulf %26, %27 : vector<24x128xf32>
    %cst_15 = arith.constant dense<0.000000e+00> : vector<128xf32>
    %29 = vector.multi_reduction <add>, %28, %cst_15 [0] : vector<24x128xf32> to vector<128xf32>
    %30 = vector.shape_cast %29 : vector<128xf32> to vector<1x128xf32>
    %31 = vector.broadcast %9 : vector<1x1xf32> to vector<1x128xf32>
    %32 = arith.addf %30, %31 : vector<1x128xf32>
    %c0_16 = arith.constant 0 : index
    %c0_17 = arith.constant 0 : index
    %33 = vector.load %arg4[%c0_16, %c0_17] : memref<1x128xf32, #tpu.memory_space<vmem>>, vector<1x128xf32>
    tpu.vector_store %arg4[%c0_16, %c0_17], %32 {strides = array<i32>} : memref<1x128xf32, #tpu.memory_space<vmem>>, vector<1x128xf32>,
    return
  }
  func.func @transform_0(%arg0: i32) -> (i32, i32) {
    %c0_i32 = arith.constant 0 : i32
    %c0_i32_0 = arith.constant 0 : i32
    return %c0_i32, %arg0 : i32, i32
  }
  func.func @transform_1(%arg0: i32) -> (i32, i32, i32) {
    %c0_i32 = arith.constant 0 : i32
    %c0_i32_0 = arith.constant 0 : i32
    %c0_i32_1 = arith.constant 0 : i32
    %c0_i32_2 = arith.constant 0 : i32
    return %c0_i32, %c0_i32_0, %c0_i32_1 : i32, i32, i32
  }
  func.func @transform_2(%arg0: i32) -> (i32, i32) {
    %c0_i32 = arith.constant 0 : i32
    %c0_i32_0 = arith.constant 0 : i32
    %c0_i32_1 = arith.constant 0 : i32
    return %c0_i32, %c0_i32_0 : i32, i32
  }
  func.func @transform_3(%arg0: i32) -> (i32, i32) {
    %c0_i32 = arith.constant 0 : i32
    %c0_i32_0 = arith.constant 0 : i32
    return %c0_i32, %arg0 : i32, i32
  }
}

</mosaic_0001>

<bundles_post_ra>
// kernel: _forward_jit.1
= control target key start
LH: loop header
LB: loop body
LE: loop exit
PB: predicated region body
PF: predicated region fallthrough
CT: control target
= control target key end

     0   :  { %v306_v2 = vmov 0   ;;  %s383_s0 = inlined_call_operand.vmem [shape: f32[1,64], index: 0, kind: input, shape index: {}]   ;;  %s384_s1 = inlined_call_operand.vmem [shape: bf16[2,24,24], index: 1, kind: input, shape index: {}]   ;;  %s385_s2 = inlined_call_operand.vmem [shape: f32[24,6], index: 2, kind: input, shape index: {}]   ;;  %s386_s3 = inlined_call_operand.hbm [shape: f32[1,64], index: 3, kind: output, shape index: {}]  }
   0x1   :  { %v336_v0 = vld [vmem:[%s385_s2 + $0x10] sm:$0xff]  ;;  %v341_v1 = vld [vmem:[%s385_s2] sm:$0xff]  ;;  %249 = vset.pattern.permute.xlu1 %v306_v2  ;;  %247 = vset.pattern.permute.xlu0 %v306_v2 }
   0x2   :  { %8 = vsyncpa [#allocation3], 0  ;;  %40 = vperm.xlu0 %247, %v336_v0   ;;  %30 = vperm.xlu1 %249, %v341_v1   ;;  %v307_v3 = vmov 1   ;;  %v17_v4 = vld [vmem:[%s385_s2 + $0x8] sm:$0xff]  ;;  %v308_v5 = vmov 2   ;;  %vm96_vm0 = vcmask 1043456  }
   0x3   :  { %250 = vset.pattern.permute.xlu2 %v307_v3  ;;  %v261_v9 = vld [vmem:[%s383_s0] ss:$0 sm:$0xff]  ;;  %v21_v20 = vld [vmem:[%s384_s1 + $0x8] sm:$0xf]  ;;  %vm89_vm1 = vcmask 195584   ;;  %v309_v29 = vmov 3  }
   0x4   :  { %50 = vperm.xlu2 %250, %v341_v1   ;;  %v86_v24 = vunpack.c.l.b16 %v21_v20  ;;  %v234_v27 = vld [vmem:[%s384_s1] sm:$0xff]  ;;  %v310_v30 = vmov 4   ;;  %v311_v33 = vmov 5   ;;  %v221_v44 = vld [vmem:[%s384_s1 + $0x14] sm:$0xf]  ;;  %v235_v51 = vld [vmem:[%s384_s1 + $0xc] sm:$0xff] }
   0x5   :  { %v26_v41 = vld [vmem:[%s385_s2] sm:$0x1]  ;;  %v140_v48 = vunpack.c.l.b16 %v221_v44  ;;  %s312_s1 = smov [#allocation2]   ;;  %s210_s4 = sshll.u32 %s386_s3, 4  ;;  %s211_s4 = int_to_ptr.hbm [resolvable:$true] %s210_s4 }
   0x6   :  { %v88_v28 = vpack.c.b16 %v86_v24, %v86_v24  ;;  %s208_s28 = sshll.u32 %s312_s1, 4  ;;  %s209_s28 = int_to_ptr.vmem [resolvable:$true] %s208_s28 }
   0x7   :  { %v142_v52 = vpack.c.b16 %v140_v48, %v140_v48 }
   0xa   :  { %248 = vset.pattern.permute.xlu0 %v307_v3  ;;  %35 = vperm.xlu1 %249, %v17_v4  }
   0xb   :  { %58 = vperm.xlu0 %248, %v336_v0  }
   0xc   :  { %54 = vperm.xlu2 %250, %v17_v4  }
  0x12   :  { %251 = vset.pattern.permute.xlu1 %v308_v5 }
  0x13   :  { %253 = vset.pattern.permute.xlu0 %v308_v5  ;;  %78 = vperm.xlu1 %251, %v336_v0  }
  0x14   :  { %74 = vperm.xlu0 %253, %v17_v4   ;;  %252 = vset.pattern.permute.xlu2 %v308_v5 }
  0x15   :  { %70 = vperm.xlu2 %252, %v341_v1  }
  0x1b   :  { %254 = vset.pattern.permute.xlu1 %v309_v29 }
  0x1c   :  { %257 = vset.pattern.permute.xlu0 %v310_v30  ;;  %124 = vperm.xlu1 %254, %v341_v1  }
  0x1d   :  { %178 = vperm.xlu0 %257, %v17_v4   ;;  %255 = vset.pattern.permute.xlu2 %v309_v29 }
  0x1e   :  { %128 = vperm.xlu2 %255, %v17_v4  }
  0x24   :  { %132 = vperm.xlu1 %254, %v336_v0  }
  0x25   :  { %260 = vset.pattern.permute.xlu0 %v311_v33 }
  0x26   :  { %256 = vset.pattern.permute.xlu2 %v310_v30 }
  0x27   :  { %174 = vperm.xlu2 %256, %v341_v1  }
  0x2c   :  { %258 = vset.pattern.permute.xlu1 %v310_v30 }
  0x2d   :  { %182 = vperm.xlu1 %258, %v336_v0  }
  0x2f   :  { %259 = vset.pattern.permute.xlu2 %v311_v33 }
  0x30   :  { %198 = vperm.xlu2 %259, %v26_v41  }
  0x5e   :  { %v51_v6 = vpop.permute.xlu2 %50 }
  0x66   :  { %v55_v15 = vpop.permute.xlu2 %54 }
  0x6f   :  { %v71_v36 = vpop.permute.xlu2 %70 }
  0x74   :  { %v41_v7 = vpop.permute.xlu0 %40  ;;  %v31_v8 = vpop.permute.xlu1 %30 }
  0x75   :  { %v48_v10 = vmul.f32 %v261_v9, %v41_v7  ;;  %v46_v12 = vmul.f32 %v261_v9, %v31_v8 }
  0x77   :  { %v61_v18 = vadd.f32 %v51_v6, %v46_v12 }
  0x78   :  { %v129_v56 = vpop.permute.xlu2 %128 }
  0x7c   :  { %v36_v11 = vpop.permute.xlu1 %35 }
  0x7d   :  { %v47_v13 = vmul.f32 %v261_v9, %v36_v11  ;;  %v59_v14 = vpop.permute.xlu0 %58 }
  0x7e   :  { %v63_v16 = vadd.f32 %v59_v14, %v48_v10 }
  0x7f   :  { %v62_v17 = vadd.f32 %v55_v15, %v47_v13 }
  0x80   :  { %262 = vtanh.f32 %v63_v16 }
  0x81   :  { %264 = vtanh.f32 %v62_v17  ;;  %v175_v0 = vpop.permute.xlu2 %174 }
  0x82   :  { %266 = vtanh.f32 %v61_v18 }
  0x85   :  { %v79_v32 = vpop.permute.xlu1 %78 }
  0x86   :  { %v263_v19 = vpop.eup %262  ;;  %v75_v35 = vpop.permute.xlu0 %74 }
  0x87   :  { %v68_v21 = vpack.c.bf16 %v263_v19, %v263_v19  ;;  %v265_v22 = vpop.eup %264 }
  0x88   :  { %v267_v25 = vpop.eup %266 }
  0x89   :  { %v98_v23 = vsel %vm96_vm0, %v68_v21, 0  ;;  %v67_v26 = vpack.c.bf16 %v265_v22, %v267_v25 }
  0x8a   :  { %106 = vmatpush.bf16.msra.mxu0 %v98_v23  ;;  %236 = vmatpush.bf16.msra.mxu2 %v98_v23  ;;  %v199_v15 = vpop.permute.xlu2 %198 }
  0x8e   :  { %107 = vmatpush.bf16.msra.mxu0 %v67_v26  ;;  %237 = vmatpush.bf16.msra.mxu2 %v67_v26  ;;  %v125_v53 = vpop.permute.xlu1 %124 }
  0x8f   :  { %v179_v1 = vpop.permute.xlu0 %178 }
  0x91   :  { %226 = vmatmul.msk.bf16.vlgmr.msra.gmra.mxu0 %vm89_vm1, %v234_v27  ;;  %227 = vmatmul.msk.bf16.vlgmr.msra.gmra.mxu2 %vm89_vm1, %v88_v28 }
  0x96   :  { %v133_v57 = vpop.permute.xlu1 %132 }
  0x9f   :  { %v183_v4 = vpop.permute.xlu1 %182 }
 0x10e   :  { %v109_v31 = vpop.f32.mrf.mxu0 }
 0x10f   :  { %v110_v40 = vadd.f32 %v109_v31, %v71_v36 }
 0x114   :  { %v114_v34 = vpop.f32.mrf.mxu2 }
 0x115   :  { %v115_v37 = vadd.f32 %v114_v34, %v79_v32 }
 0x116   :  { %v111_v38 = vpop.f32.mrf.mxu0 }
 0x117   :  { %268 = vtanh.f32 %v115_v37  ;;  %v112_v39 = vadd.f32 %v111_v38, %v75_v35 }
 0x119   :  { %270 = vtanh.f32 %v112_v39 }
 0x11a   :  { %272 = vtanh.f32 %v110_v40 }
 0x11c   :  { %v116_v42 = vpop.f32.mrf.mxu2 }
 0x11d   :  { %v269_v43 = vpop.eup %268 }
 0x11e   :  { %v122_v45 = vpack.c.bf16 %v269_v43, %v269_v43 }
 0x11f   :  { %v271_v46 = vpop.eup %270 }
 0x120   :  { %v150_v47 = vsel %vm96_vm0, %v122_v45, 0  ;;  %v273_v49 = vpop.eup %272 }
 0x121   :  { %158 = vmatpush.bf16.msra.mxu1 %v150_v47  ;;  %238 = vmatpush.bf16.msra.mxu3 %v150_v47  ;;  %v121_v50 = vpack.c.bf16 %v271_v46, %v273_v49 }
 0x125   :  { %159 = vmatpush.bf16.msra.mxu1 %v121_v50  ;;  %239 = vmatpush.bf16.msra.mxu3 %v121_v50 }
 0x128   :  { %232 = vmatmul.msk.bf16.vlgmr.msra.gmra.mxu1 %vm89_vm1, %v235_v51  ;;  %233 = vmatmul.msk.bf16.vlgmr.msra.gmra.mxu3 %vm89_vm1, %v142_v52 }
 0x1a5   :  { %v161_v54 = vpop.f32.mrf.mxu1 }
 0x1a6   :  { %v162_v55 = vadd.f32 %v161_v54, %v125_v53 }
 0x1a8   :  { %274 = vtanh.f32 %v162_v55 }
 0x1ab   :  { %v166_v58 = vpop.f32.mrf.mxu3 }
 0x1ac   :  { %v167_v59 = vadd.f32 %v166_v58, %v133_v57 }
 0x1ad   :  { %v163_v60 = vpop.f32.mrf.mxu1 }
 0x1ae   :  { %v164_v61 = vadd.f32 %v163_v60, %v129_v56  ;;  %276 = vtanh.f32 %v167_v59  ;;  %v275_v63 = vpop.eup %274 }
 0x1af   :  { %v185_v5 = vmul.f32 %v275_v63, %v175_v0 }
 0x1b0   :  { %278 = vtanh.f32 %v164_v61 }
 0x1b3   :  { %v168_v62 = vpop.f32.mrf.mxu3 }
 0x1b4   :  { %v277_v2 = vpop.eup %276 }
 0x1b5   :  { %v187_v7 = vmul.f32 %v277_v2, %v183_v4 }
 0x1b6   :  { %v279_v3 = vpop.eup %278 }
 0x1b7   :  { %v186_v6 = vmul.f32 %v279_v3, %v179_v1 }
 0x1b9   :  { %v188_v8 = vadd.f32 %v186_v6, %v185_v5 }
 0x1bb   :  { %v189_v9 = vadd.f32 %v188_v8, %v187_v7 }
 0x1bd   :  { %v190_v10 = vrot.slane %v189_v9, 4 }
 0x1bf   :  { %v191_v11 = vadd.f32 %v190_v10, %v189_v9 }
 0x1c1   :  { %v192_v12 = vrot.slane %v191_v11, 2 }
 0x1c3   :  { %v193_v13 = vadd.f32 %v192_v12, %v191_v11 }
 0x1c5   :  { %v194_v14 = vrot.slane %v193_v13, 1 }
 0x1c7   :  { %v195_v16 = vadd.f32 %v194_v14, %v193_v13 }
 0x1c9   :  { %v201_v17 = vadd.f32 %v199_v15, %v195_v16 }
 0x1cb   :  { %202 = vst [vmem:[#allocation2] sm:$0x1] %v201_v17 }
 0x1cc   :  { %213 = dma.vmem_to_hbm [thread:$0]  %s209_s28, 16, %s211_s4, [#allocation3]  }
 0x1cd   :  { %304 = dma.done.wait [#allocation3], 16  }
 0x1ce   :  { %305 = vsyncadd [#allocation3], 4294967280 }
 0x1cf   :  { %218 = vsyncpa [#allocation3], 1 }

</bundles_post_ra>
